<compile_context>
chip_gen: v7x
topology: tpu7x:2x2x1
jax: 0.10.0
libtpu: 0.0.40
codegen_flags: <defaults>
</compile_context>

<pallas_src>
import jax
import jax.numpy as jnp
from jax import lax
from jax.experimental import pallas as pl
from jax.experimental.pallas import tpu as pltpu

BN_EPS = 1e-5
H1, H2 = 100, 50
LANE = 128


def _round_up(n, m=LANE):
    return ((n + m - 1) // m) * m


def _vmem_limit_bytes():
    """Generation-aware VMEM budget (~0.7x capacity: 64 MiB/TC v7x, 128 MiB v5e/v6e)."""
    cap = 64 * 1024 * 1024  # conservative fallback = v7x per-TensorCore VMEM
    try:
        info = pltpu.get_tpu_info()
        cap = int(getattr(info, "vmem_capacity_bytes", cap))
    except Exception:
        pass
    return int(0.70 * cap)


def max_whole_batch_rows():
    """Approximate whole-batch cap for the training-mode kernel.

    ~2 KiB of resident activations per row (x bf16 + two f32 hiddens + bf16
    copies + out) -> roughly ~20K rows on v7x, ~45K rows on v5e/v6e.
    """
    return max(2, (_vmem_limit_bytes() - (1 << 20)) // 2048)


# ----------------------------------------------------------------------------
# Training-mode kernel (batch-statistics BN, matches nn.Module default forward)
# ----------------------------------------------------------------------------
def _qnetwork_train_kernel(
    x_ref,
    w1_ref, g1_ref, be1_ref,
    w2_ref, g2_ref, be2_ref,
    w3_ref, b3_ref,
    out_ref,
):
    """Fused MLP forward: 3 MXU matmuls + 2 folded BatchNorms + ReLU, one program.

    Pre-BN linear biases b1/b2 are intentionally omitted: they cancel exactly
    against BatchNorm's batch-mean subtraction.
    """
    inv_b = 1.0 / x_ref.shape[0]

    def bn_relu(h, g_ref, be_ref):
        # One-pass batch statistics (single traversal of h), all in f32.
        mean = jnp.sum(h, axis=0, keepdims=True) * inv_b
        var = jnp.maximum(
            jnp.sum(h * h, axis=0, keepdims=True) * inv_b - mean * mean, 0.0)
        scale = g_ref[...] * lax.rsqrt(var + BN_EPS)      # [1, Hpad]
        shift = be_ref[...] - mean * scale                # [1, Hpad]
        return jnp.maximum(h * scale + shift, 0.0)        # BN + ReLU

    # Linear(state, 128-padded 100)  (x arrives already bf16)
    h = jnp.dot(x_ref[...], w1_ref[...], preferred_element_type=jnp.float32)
    h = bn_relu(h, g1_ref, be1_ref)

    # Linear(128-padded 100, 128-padded 50)
    h = jnp.dot(h.astype(jnp.bfloat16), w2_ref[...],
                preferred_element_type=jnp.float32)
    h = bn_relu(h, g2_ref, be2_ref)

    # Linear(128-padded 50, action_size) + bias -- narrow (B, action_size) store.
    out_ref[...] = jnp.dot(h.astype(jnp.bfloat16), w3_ref[...],
                           preferred_element_type=jnp.float32) + b3_ref[...]


def qnetwork_forward(x, params, action_size):
    """Training-mode (batch-stats BN) fused forward; returns [B, action_size].

    The whole batch must be VMEM-resident (BN reduces over it) -- feed the
    largest batch possible per call (see max_whole_batch_rows()); at tiny B
    the call is pure launch/DMA overhead.
    """
    batch = x.shape[0]
    if batch < 2:
        raise ValueError("BatchNorm1d with batch statistics requires batch >= 2")

    x_bf16 = x.astype(jnp.bfloat16)  # cast in wrapper; fuses into the producer
    args = (
        x_bf16,
        params["w1"], params["g1"], params["be1"],
        params["w2"], params["g2"], params["be2"],
        params["w3"], params["b3"],
    )
    vmem = pl.BlockSpec(memory_space=pltpu.MemorySpace.VMEM)

    h1p = params["w1"].shape[1]
    h2p = params["w2"].shape[1]
    flops = 2 * batch * (x.shape[1] * h1p + h1p * h2p + h2p * action_size)
    bytes_accessed = sum(int(a.size) * a.dtype.itemsize for a in args) \
        + batch * action_size * 4
    transcendentals = h1p + h2p  # one rsqrt per (padded) BN feature

    return pl.pallas_call(
        _qnetwork_train_kernel,
        out_shape=jax.ShapeDtypeStruct((batch, action_size), jnp.float32),
        in_specs=[vmem] * len(args),
        out_specs=vmem,
        compiler_params=pltpu.CompilerParams(vmem_limit_bytes=_vmem_limit_bytes()),
        cost_estimate=pl.CostEstimate(
            flops=flops,
            transcendentals=transcendentals,
            bytes_accessed=bytes_accessed,
        ),
    )(*args)


# ----------------------------------------------------------------------------
# Inference-mode kernel (running-stats BN folded into the linears), gridded
# over batch tiles -> both v7x TensorCores + pipelined input/output DMA.
# ----------------------------------------------------------------------------
def _qnetwork_infer_kernel(x_ref, w1_ref, b1_ref, w2_ref, b2_ref,
                           w3_ref, b3_ref, out_ref):
    h = jnp.maximum(
        jnp.dot(x_ref[...], w1_ref[...], preferred_element_type=jnp.float32)
        + b1_ref[...], 0.0)
    h = jnp.maximum(
        jnp.dot(h.astype(jnp.bfloat16), w2_ref[...],
                preferred_element_type=jnp.float32) + b2_ref[...], 0.0)
    out_ref[...] = jnp.dot(h.astype(jnp.bfloat16), w3_ref[...],
                           preferred_element_type=jnp.float32) + b3_ref[...]


def qnetwork_infer(x, params, action_size, tile_b=512):
    """Inference-mode (running-stats BN) forward, gridded over batch tiles."""
    batch, state = x.shape
    tb = min(tile_b, _round_up(batch, 8))
    batch_pad = _round_up(batch, tb)

    x_bf16 = x.astype(jnp.bfloat16)
    if batch_pad != batch:
        x_bf16 = jnp.pad(x_bf16, ((0, batch_pad - batch), (0, 0)))

    h1p = params["w1"].shape[1]
    h2p = params["w2"].shape[1]

    out = pl.pallas_call(
        _qnetwork_infer_kernel,
        out_shape=jax.ShapeDtypeStruct((batch_pad, action_size), jnp.float32),
        grid=(batch_pad // tb,),
        in_specs=[
            pl.BlockSpec((tb, state), lambda i: (i, 0)),
            pl.BlockSpec((state, h1p), lambda i: (0, 0)),
            pl.BlockSpec((1, h1p), lambda i: (0, 0)),
            pl.BlockSpec((h1p, h2p), lambda i: (0, 0)),
            pl.BlockSpec((1, h2p), lambda i: (0, 0)),
            pl.BlockSpec((h2p, action_size), lambda i: (0, 0)),
            pl.BlockSpec((1, action_size), lambda i: (0, 0)),
        ],
        out_specs=pl.BlockSpec((tb, action_size), lambda i: (i, 0)),
        compiler_params=pltpu.CompilerParams(
            dimension_semantics=("parallel",),
            vmem_limit_bytes=_vmem_limit_bytes(),
        ),
    )(x_bf16, params["w1"], params["b1"], params["w2"], params["b2"],
      params["w3"], params["b3"])

    return out[:batch] if batch_pad != batch else out


# ----------------------------------------------------------------------------
# Parameter construction (PyTorch-style init + padded kernel params)
# ----------------------------------------------------------------------------
def init_params(key, state_size, action_size):
    """Returns (train_params, infer_params, raw_unpadded_f32_params)."""
    keys = jax.random.split(key, 6)

    def linear(kw, kb, fan_in, fan_out):
        bound = 1.0 / jnp.sqrt(jnp.float32(fan_in))
        w = jax.random.uniform(kw, (fan_in, fan_out), jnp.float32, -bound, bound)
        b = jax.random.uniform(kb, (1, fan_out), jnp.float32, -bound, bound)
        return w, b

    w1, b1 = linear(keys[0], keys[1], state_size, H1)
    w2, b2 = linear(keys[2], keys[3], H1, H2)
    w3, b3 = linear(keys[4], keys[5], H2, action_size)

    g1, be1 = jnp.ones((1, H1), jnp.float32), jnp.zeros((1, H1), jnp.float32)
    g2, be2 = jnp.ones((1, H2), jnp.float32), jnp.zeros((1, H2), jnp.float32)
    # Fresh BatchNorm running statistics.
    rm1, rv1 = jnp.zeros((1, H1), jnp.float32), jnp.ones((1, H1), jnp.float32)
    rm2, rv2 = jnp.zeros((1, H2), jnp.float32), jnp.ones((1, H2), jnp.float32)

    raw = {"w1": w1, "b1": b1, "g1": g1, "be1": be1, "rm1": rm1, "rv1": rv1,
           "w2": w2, "b2": b2, "g2": g2, "be2": be2, "rm2": rm2, "rv2": rv2,
           "w3": w3, "b3": b3}

    h1p, h2p = _round_up(H1), _round_up(H2)

    def pad2(a, rows, cols):
        return jnp.pad(a, ((0, rows - a.shape[0]), (0, cols - a.shape[1])))

    # Training-mode params: pre-BN biases dropped (cancel against batch mean);
    # padded gamma/beta/weights are zero so padded features stay exactly 0.
    train = {
        "w1": pad2(w1, state_size, h1p).astype(jnp.bfloat16),
        "g1": pad2(g1, 1, h1p), "be1": pad2(be1, 1, h1p),
        "w2": pad2(w2, h1p, h2p).astype(jnp.bfloat16),
        "g2": pad2(g2, 1, h2p), "be2": pad2(be2, 1, h2p),
        "w3": pad2(w3, h2p, action_size).astype(jnp.bfloat16),
        "b3": b3,
    }

    # Inference-mode params: BN (running stats) folded into each linear;
    # pre-BN biases b1/b2 restored here (they do NOT cancel in eval mode).
    def fold(w, b, g, be, rm, rv, rows, cols):
        scale = g * lax.rsqrt(rv + BN_EPS)
        shift = be - rm * scale
        return (pad2(w * scale, rows, cols).astype(jnp.bfloat16),
                pad2(b * scale + shift, 1, cols))

    w1i, b1i = fold(w1, b1, g1, be1, rm1, rv1, state_size, h1p)
    w2i, b2i = fold(w2, b2, g2, be2, rm2, rv2, h1p, h2p)
    infer = {
        "w1": w1i, "b1": b1i,
        "w2": w2i, "b2": b2i,
        "w3": pad2(w3, h2p, action_size).astype(jnp.bfloat16),
        "b3": b3,
    }
    return train, infer, raw


# ----------------------------------------------------------------------------
# References
# ----------------------------------------------------------------------------
def _reference_train_matched(x, p):
    """Pure-JAX reference mirroring the kernel math (bf16 matmuls, one-pass BN)."""
    def bn_relu(h, g, be):
        mean = h.mean(0, keepdims=True)
        var = jnp.maximum((h * h).mean(0, keepdims=True) - mean * mean, 0.0)
        scale = g * lax.rsqrt(var + BN_EPS)
        return jnp.maximum(h * scale + (be - mean * scale), 0.0)

    h = jnp.dot(x.astype(jnp.bfloat16), p["w1"], preferred_element_type=jnp.float32)
    h = bn_relu(h, p["g1"], p["be1"])
    h = jnp.dot(h.astype(jnp.bfloat16), p["w2"], preferred_element_type=jnp.float32)
    h = bn_relu(h, p["g2"], p["be2"])
    return jnp.dot(h.astype(jnp.bfloat16), p["w3"],
                   preferred_element_type=jnp.float32) + p["b3"]


def _reference_train_f32(x, p):
    """Exact PyTorch train-mode semantics in f32 (with the original biases)."""
    def bn(h, g, be):
        m = h.mean(0, keepdims=True)
        v = ((h - m) ** 2).mean(0, keepdims=True)
        return (h - m) / jnp.sqrt(v + BN_EPS) * g + be

    h = jnp.maximum(bn(x @ p["w1"] + p["b1"], p["g1"], p["be1"]), 0.0)
    h = jnp.maximum(bn(h @ p["w2"] + p["b2"], p["g2"], p["be2"]), 0.0)
    return h @ p["w3"] + p["b3"]


def _reference_infer_matched(x, p):
    h = jnp.maximum(jnp.dot(x.astype(jnp.bfloat16), p["w1"],
                            preferred_element_type=jnp.float32) + p["b1"], 0.0)
    h = jnp.maximum(jnp.dot(h.astype(jnp.bfloat16), p["w2"],
                            preferred_element_type=jnp.float32) + p["b2"], 0.0)
    return jnp.dot(h.astype(jnp.bfloat16), p["w3"],
                   preferred_element_type=jnp.float32) + p["b3"]


def _reference_infer_f32(x, p):
    """Exact PyTorch eval-mode semantics in f32 (running statistics BN)."""
    def bn(h, g, be, rm, rv):
        return (h - rm) / jnp.sqrt(rv + BN_EPS) * g + be

    h = jnp.maximum(bn(x @ p["w1"] + p["b1"], p["g1"], p["be1"], p["rm1"], p["rv1"]), 0.0)
    h = jnp.maximum(bn(h @ p["w2"] + p["b2"], p["g2"], p["be2"], p["rm2"], p["rv2"]), 0.0)
    return h @ p["w3"] + p["b3"]


if __name__ == "__main__":
    STATE_SIZE = 16
    ACTION_SIZE = 4
    BATCH = 8  # tiny demo batch; batch env steps / stack nets for throughput

    key = jax.random.PRNGKey(0)
    k_param, k_x = jax.random.split(key)

    train_p, infer_p, raw = init_params(k_param, STATE_SIZE, ACTION_SIZE)
    x = jax.random.normal(k_x, (BATCH, STATE_SIZE), jnp.float32)

    # --- training-mode (batch-stats BN) fused kernel: matches module's default forward ---
    q = jax.block_until_ready(qnetwork_forward(x, train_p, ACTION_SIZE))
    assert q.shape == (BATCH, ACTION_SIZE)
    assert jnp.allclose(q, _reference_train_matched(x, train_p),
                        atol=1e-3, rtol=1e-3), "train kernel vs matched ref"
    assert jnp.allclose(q, _reference_train_f32(x, raw),
                        atol=1e-1, rtol=1e-1), "train kernel vs f32 ref"

    # --- inference-mode (running-stats BN) gridded, megacore-parallel kernel ---
    q_inf = jax.block_until_ready(qnetwork_infer(x, infer_p, ACTION_SIZE))
    assert q_inf.shape == (BATCH, ACTION_SIZE)
    assert jnp.allclose(q_inf, _reference_infer_matched(x, infer_p),
                        atol=1e-3, rtol=1e-3), "infer kernel vs matched ref"
    assert jnp.allclose(q_inf, _reference_infer_f32(x, raw),
                        atol=1e-1, rtol=1e-1), "infer kernel vs f32 ref"

    # TODO(synk): BatchNorm1d running_mean/running_var updates (training-time
    # buffer side effects) are not emitted; only forward outputs are produced.
    print("KERNEL_OK")
</pallas_src>

<mosaic_0001>
module attributes {stable_mosaic.version = 11 : i64} {
  func.func @_qnetwork_train_kernel(%arg0: memref<8x16xbf16, #tpu.memory_space<vmem>>, %arg1: memref<16x128xbf16, #tpu.memory_space<vmem>>, %arg2: memref<1x128xf32, #tpu.memory_space<vmem>>, %arg3: memref<1x128xf32, #tpu.memory_space<vmem>>, %arg4: memref<128x128xbf16, #tpu.memory_space<vmem>>, %arg5: memref<1x128xf32, #tpu.memory_space<vmem>>, %arg6: memref<1x128xf32, #tpu.memory_space<vmem>>, %arg7: memref<128x4xbf16, #tpu.memory_space<vmem>>, %arg8: memref<1x4xf32, #tpu.memory_space<vmem>>, %arg9: memref<8x4xf32, #tpu.memory_space<vmem>>) attributes {dimension_semantics = [], scalar_prefetch = 0 : i64, scratch_operands = 0 : i64, tpu.core_type = #tpu.core_type<tc>} {
    %c0 = arith.constant 0 : index
    %c0_0 = arith.constant 0 : index
    %0 = vector.load %arg0[%c0, %c0_0] : memref<8x16xbf16, #tpu.memory_space<vmem>>, vector<8x16xbf16>
    %c0_1 = arith.constant 0 : index
    %c0_2 = arith.constant 0 : index
    %1 = vector.load %arg1[%c0_1, %c0_2] : memref<16x128xbf16, #tpu.memory_space<vmem>>, vector<16x128xbf16>
    %cst = arith.constant dense<0.000000e+00> : vector<8x128xf32>
    %2 = tpu.matmul %0, %1, %cst {dimension_numbers = #tpu.dot_dimension_numbers<[1], [0], [0], [1], [0, 0, 1, 1], [], []>} : vector<8x16xbf16>, vector<16x128xbf16>, vector<8x128xf32> -> vector<8x128xf32>
    %cst_3 = arith.constant dense<0.000000e+00> : vector<128xf32>
    %3 = vector.multi_reduction <add>, %2, %cst_3 [0] : vector<8x128xf32> to vector<128xf32>
    %4 = vector.shape_cast %3 : vector<128xf32> to vector<1x128xf32>
    %cst_4 = arith.constant 1.250000e-01 : f32
    %5 = vector.broadcast %cst_4 : f32 to vector<1x128xf32>
    %6 = arith.mulf %4, %5 : vector<1x128xf32>
    %7 = arith.mulf %2, %2 : vector<8x128xf32>
    %cst_5 = arith.constant dense<0.000000e+00> : vector<128xf32>
    %8 = vector.multi_reduction <add>, %7, %cst_5 [0] : vector<8x128xf32> to vector<128xf32>
    %9 = vector.shape_cast %8 : vector<128xf32> to vector<1x128xf32>
    %cst_6 = arith.constant 1.250000e-01 : f32
    %10 = vector.broadcast %cst_6 : f32 to vector<1x128xf32>
    %11 = arith.mulf %9, %10 : vector<1x128xf32>
    %12 = arith.mulf %6, %6 : vector<1x128xf32>
    %13 = arith.subf %11, %12 : vector<1x128xf32>
    %cst_7 = arith.constant 0.000000e+00 : f32
    %14 = vector.broadcast %cst_7 : f32 to vector<1x128xf32>
    %15 = arith.maximumf %13, %14 : vector<1x128xf32>
    %c0_8 = arith.constant 0 : index
    %c0_9 = arith.constant 0 : index
    %16 = vector.load %arg2[%c0_8, %c0_9] : memref<1x128xf32, #tpu.memory_space<vmem>>, vector<1x128xf32>
    %cst_10 = arith.constant 9.99999974E-6 : f32
    %17 = vector.broadcast %cst_10 : f32 to vector<1x128xf32>
    %18 = arith.addf %15, %17 : vector<1x128xf32>
    %19 = math.rsqrt %18 : vector<1x128xf32>
    %20 = arith.mulf %16, %19 : vector<1x128xf32>
    %c0_11 = arith.constant 0 : index
    %c0_12 = arith.constant 0 : index
    %21 = vector.load %arg3[%c0_11, %c0_12] : memref<1x128xf32, #tpu.memory_space<vmem>>, vector<1x128xf32>
    %22 = arith.mulf %6, %20 : vector<1x128xf32>
    %23 = arith.subf %21, %22 : vector<1x128xf32>
    %24 = vector.broadcast %20 : vector<1x128xf32> to vector<8x128xf32>
    %25 = arith.mulf %2, %24 : vector<8x128xf32>
    %26 = vector.broadcast %23 : vector<1x128xf32> to vector<8x128xf32>
    %27 = arith.addf %25, %26 : vector<8x128xf32>
    %cst_13 = arith.constant 0.000000e+00 : f32
    %28 = vector.broadcast %cst_13 : f32 to vector<8x128xf32>
    %29 = arith.maximumf %27, %28 : vector<8x128xf32>
    %30 = arith.truncf %29 : vector<8x128xf32> to vector<8x128xbf16>
    %c0_14 = arith.constant 0 : index
    %c0_15 = arith.constant 0 : index
    %31 = vector.load %arg4[%c0_14, %c0_15] : memref<128x128xbf16, #tpu.memory_space<vmem>>, vector<128x128xbf16>
    %cst_16 = arith.constant dense<0.000000e+00> : vector<8x128xf32>
    %32 = tpu.matmul %30, %31, %cst_16 {dimension_numbers = #tpu.dot_dimension_numbers<[1], [0], [0], [1], [0, 0, 1, 1], [], []>} : vector<8x128xbf16>, vector<128x128xbf16>, vector<8x128xf32> -> vector<8x128xf32>
    %cst_17 = arith.constant dense<0.000000e+00> : vector<128xf32>
    %33 = vector.multi_reduction <add>, %32, %cst_17 [0] : vector<8x128xf32> to vector<128xf32>
    %34 = vector.shape_cast %33 : vector<128xf32> to vector<1x128xf32>
    %cst_18 = arith.constant 1.250000e-01 : f32
    %35 = vector.broadcast %cst_18 : f32 to vector<1x128xf32>
    %36 = arith.mulf %34, %35 : vector<1x128xf32>
    %37 = arith.mulf %32, %32 : vector<8x128xf32>
    %cst_19 = arith.constant dense<0.000000e+00> : vector<128xf32>
    %38 = vector.multi_reduction <add>, %37, %cst_19 [0] : vector<8x128xf32> to vector<128xf32>
    %39 = vector.shape_cast %38 : vector<128xf32> to vector<1x128xf32>
    %cst_20 = arith.constant 1.250000e-01 : f32
    %40 = vector.broadcast %cst_20 : f32 to vector<1x128xf32>
    %41 = arith.mulf %39, %40 : vector<1x128xf32>
    %42 = arith.mulf %36, %36 : vector<1x128xf32>
    %43 = arith.subf %41, %42 : vector<1x128xf32>
    %cst_21 = arith.constant 0.000000e+00 : f32
    %44 = vector.broadcast %cst_21 : f32 to vector<1x128xf32>
    %45 = arith.maximumf %43, %44 : vector<1x128xf32>
    %c0_22 = arith.constant 0 : index
    %c0_23 = arith.constant 0 : index
    %46 = vector.load %arg5[%c0_22, %c0_23] : memref<1x128xf32, #tpu.memory_space<vmem>>, vector<1x128xf32>
    %cst_24 = arith.constant 9.99999974E-6 : f32
    %47 = vector.broadcast %cst_24 : f32 to vector<1x128xf32>
    %48 = arith.addf %45, %47 : vector<1x128xf32>
    %49 = math.rsqrt %48 : vector<1x128xf32>
    %50 = arith.mulf %46, %49 : vector<1x128xf32>
    %c0_25 = arith.constant 0 : index
    %c0_26 = arith.constant 0 : index
    %51 = vector.load %arg6[%c0_25, %c0_26] : memref<1x128xf32, #tpu.memory_space<vmem>>, vector<1x128xf32>
    %52 = arith.mulf %36, %50 : vector<1x128xf32>
    %53 = arith.subf %51, %52 : vector<1x128xf32>
    %54 = vector.broadcast %50 : vector<1x128xf32> to vector<8x128xf32>
    %55 = arith.mulf %32, %54 : vector<8x128xf32>
    %56 = vector.broadcast %53 : vector<1x128xf32> to vector<8x128xf32>
    %57 = arith.addf %55, %56 : vector<8x128xf32>
    %cst_27 = arith.constant 0.000000e+00 : f32
    %58 = vector.broadcast %cst_27 : f32 to vector<8x128xf32>
    %59 = arith.maximumf %57, %58 : vector<8x128xf32>
    %60 = arith.truncf %59 : vector<8x128xf32> to vector<8x128xbf16>
    %c0_28 = arith.constant 0 : index
    %c0_29 = arith.constant 0 : index
    %61 = vector.load %arg7[%c0_28, %c0_29] : memref<128x4xbf16, #tpu.memory_space<vmem>>, vector<128x4xbf16>
    %cst_30 = arith.constant dense<0.000000e+00> : vector<8x4xf32>
    %62 = tpu.matmul %60, %61, %cst_30 {dimension_numbers = #tpu.dot_dimension_numbers<[1], [0], [0], [1], [0, 0, 1, 1], [], []>} : vector<8x128xbf16>, vector<128x4xbf16>, vector<8x4xf32> -> vector<8x4xf32>
    %c0_31 = arith.constant 0 : index
    %c0_32 = arith.constant 0 : index
    %63 = vector.load %arg8[%c0_31, %c0_32] : memref<1x4xf32, #tpu.memory_space<vmem>>, vector<1x4xf32>
    %64 = vector.broadcast %63 : vector<1x4xf32> to vector<8x4xf32>
    %65 = arith.addf %62, %64 : vector<8x4xf32>
    %c0_33 = arith.constant 0 : index
    %c0_34 = arith.constant 0 : index
    %66 = vector.load %arg9[%c0_33, %c0_34] : memref<8x4xf32, #tpu.memory_space<vmem>>, vector<8x4xf32>
    tpu.vector_store %arg9[%c0_33, %c0_34], %65 {strides = array<i32>} : memref<8x4xf32, #tpu.memory_space<vmem>>, vector<8x4xf32>,
    return
  }
}

</mosaic_0001>

<bundles_post_ra>
// kernel: tpu_custom_call.1
= control target key start
LH: loop header
LB: loop body
LE: loop exit
PB: predicated region body
PF: predicated region fallthrough
CT: control target
= control target key end

     0   :  { %v497_v0 = vmov 0.0   ;;  %vm498_vm0 = vmmov 0   ;;  %vm42_vm1 = vcmask 130048   ;;  %v112_v34 = vlaneseq  ;;  %s647_s1 = inlined_call_operand.vmem [shape: bf16[16,128], index: 1, kind: input, shape index: {}]   ;;  %s648_s0 = inlined_call_operand.vmem [shape: bf16[8,16], index: 0, kind: input, shape index: {}]   ;;  %s649_s4 = inlined_call_operand.vmem [shape: bf16[128,128], index: 4, kind: input, shape index: {}]   ;;  %s650_s2 = inlined_call_operand.vmem [shape: f32[1,128], index: 2, kind: input, shape index: {}]   ;;  %s651_s3 = inlined_call_operand.vmem [shape: f32[1,128], index: 3, kind: input, shape index: {}]   ;;  %s652_s7 = inlined_call_operand.vmem [shape: bf16[128,4], index: 7, kind: input, shape index: {}]   ;;  %s653_s5 = inlined_call_operand.vmem [shape: f32[1,128], index: 5, kind: input, shape index: {}]   ;;  %s654_s6 = inlined_call_operand.vmem [shape: f32[1,128], index: 6, kind: input, shape index: {}]   ;;  %s655_s8 = inlined_call_operand.vmem [shape: f32[1,4], index: 8, kind: input, shape index: {}]   ;;  %s656_s9 = inlined_call_operand.vmem [shape: f32[8,4], index: 9, kind: output, shape index: {}]  }
   0x1   :  { %428 = vmatprep.subr.bf16.mxu0 %v497_v0  ;;  %v476_v1 = vld [vmem:[%s647_s1] sm:$0xff]   ;;  %430 = vmatprep.mubr.msk.bf16.mxu0 %vm498_vm0, %v497_v0  ;;  %v478_v4 = vld [vmem:[%s649_s4 + $0x8] sm:$0xff]   ;;  %v479_v5 = vld [vmem:[%s649_s4 + $0x10] sm:$0xff]   ;;  %vm383_vm2 = vcmask 31744  }
   0x2   :  { %434 = vmatprep.subr.bf16.mxu1 %v497_v0  ;;  %450 = vmatprep.mubr.msk.bf16.mxu1 %vm498_vm0, %v497_v0  ;;  %v33_v2 = vld [vmem:[%s648_s0] sm:$0xf]  ;;  %v480_v6 = vld [vmem:[%s649_s4 + $0x18] sm:$0xff]   ;;  %v482_v8 = vld [vmem:[%s649_s4 + $0x28] sm:$0xff]   ;;  %v113_v35 = vshrl.u32 %v112_v34, 7 }
   0x3   :  { %429 = vmatpush3.bf16.msra.mxu0 %v476_v1  ;;  %v477_v3 = vld [vmem:[%s649_s4] sm:$0xff]   ;;  %v483_v9 = vld [vmem:[%s649_s4 + $0x30] sm:$0xff]   ;;  %v484_v10 = vld [vmem:[%s649_s4 + $0x38] sm:$0xff]  }
   0x4   :  { %454 = vmatprep.subr.bf16.mxu0 %v497_v0  ;;  %435 = vmatpush3.bf16.msra.mxu1 %v477_v3  ;;  %v481_v7 = vld [vmem:[%s649_s4 + $0x20] sm:$0xff]   ;;  %v595_v37 = vsub.s32 0, %v113_v35  ;;  %v486_v50 = vld [vmem:[%s652_s7 + $0x8] sm:$0xff]   ;;  %v487_v51 = vld [vmem:[%s652_s7 + $0x10] sm:$0xff]  }
   0x5   :  { %436 = vmatprep.subr.bf16.mxu1 %v497_v0  ;;  %v104_v36 = vld [vmem:[%s650_s2] sm:$0x1]  ;;  %v488_v52 = vld [vmem:[%s652_s7 + $0x18] sm:$0xff]   ;;  %v490_v54 = vld [vmem:[%s652_s7 + $0x28] sm:$0xff]  }
   0x6   :  { %431 = vmatmul.mubr.msk.bf16.vlgmr.msra.gmra.mrb[0].mxu0 %vm42_vm1, %v33_v2  ;;  %v108_v40 = vld [vmem:[%s651_s3] sm:$0x1]  ;;  %v491_v55 = vld [vmem:[%s652_s7 + $0x30] sm:$0xff]   ;;  %v492_v56 = vld [vmem:[%s652_s7 + $0x38] sm:$0xff]  }
   0x7   :  { %470 = vmatprep.mubr.msk.bf16.mxu0 %vm498_vm0, %v497_v0  ;;  %v485_v49 = vld [vmem:[%s652_s7] sm:$0xff]  }
   0x8   :  { %437 = vmatpush3.bf16.msra.mxu1 %v478_v4  ;;  %455 = vmatpush3.bf16.msra.mxu0 %v485_v49  ;;  %v489_v53 = vld [vmem:[%s652_s7 + $0x20] sm:$0xff]  }
   0x9   :  { %438 = vmatprep.subr.bf16.mxu1 %v497_v0  ;;  %456 = vmatprep.subr.bf16.mxu0 %v497_v0 }
   0xc   :  { %439 = vmatpush3.bf16.msra.mxu1 %v479_v5  ;;  %457 = vmatpush3.bf16.msra.mxu0 %v486_v50 }
   0xd   :  { %440 = vmatprep.subr.bf16.mxu1 %v497_v0  ;;  %458 = vmatprep.subr.bf16.mxu0 %v497_v0 }
  0x10   :  { %441 = vmatpush3.bf16.msra.mxu1 %v480_v6  ;;  %459 = vmatpush3.bf16.msra.mxu0 %v487_v51 }
  0x11   :  { %442 = vmatprep.subr.bf16.mxu1 %v497_v0  ;;  %460 = vmatprep.subr.bf16.mxu0 %v497_v0 }
  0x14   :  { %443 = vmatpush3.bf16.msra.mxu1 %v481_v7  ;;  %461 = vmatpush3.bf16.msra.mxu0 %v488_v52 }
  0x15   :  { %444 = vmatprep.subr.bf16.mxu1 %v497_v0  ;;  %462 = vmatprep.subr.bf16.mxu0 %v497_v0 }
  0x18   :  { %445 = vmatpush3.bf16.msra.mxu1 %v482_v8  ;;  %463 = vmatpush3.bf16.msra.mxu0 %v489_v53 }
  0x19   :  { %446 = vmatprep.subr.bf16.mxu1 %v497_v0  ;;  %464 = vmatprep.subr.bf16.mxu0 %v497_v0 }
  0x1c   :  { %447 = vmatpush3.bf16.msra.mxu1 %v483_v9  ;;  %465 = vmatpush3.bf16.msra.mxu0 %v490_v54 }
  0x1d   :  { %448 = vmatprep.subr.bf16.mxu1 %v497_v0  ;;  %466 = vmatprep.subr.bf16.mxu0 %v497_v0 }
  0x20   :  { %449 = vmatpush3.bf16.msra.mxu1 %v484_v10  ;;  %467 = vmatpush3.bf16.msra.mxu0 %v491_v55 }
  0x21   :  { %468 = vmatprep.subr.bf16.mxu0 %v497_v0 }
  0x24   :  { %469 = vmatpush3.bf16.msra.mxu0 %v492_v56 }
  0xd9   :  { %v80_v11 = vpop.f32.mrb[0].mxu0 }
  0xda   :  { %v86_v12 = vrot.slane %v80_v11, 4  ;;  %v93_v13 = vmul.f32 %v80_v11, %v80_v11  ;;  %v432_v14 = vpop.f32.mrb[1].mxu0 }
  0xdb   :  { %v83_v15 = vpop.f32.mrb[2].mxu0 }
  0xdc   :  { %v87_v16 = vadd.f32 %v86_v12, %v80_v11  ;;  %v94_v17 = vrot.slane %v93_v13, 4  ;;  %v433_v18 = vpop.f32.mrb[3].mxu0 }
  0xde   :  { %v88_v19 = vrot.slane %v87_v16, 2  ;;  %v95_v20 = vadd.f32 %v94_v17, %v93_v13 }
  0xe0   :  { %v89_v21 = vadd.f32 %v88_v19, %v87_v16  ;;  %v96_v22 = vrot.slane %v95_v20, 2  ;;  %v249_v16 = vld [vmem:[%s653_s5] sm:$0x1] }
  0xe1   :  { %v253_v19 = vld [vmem:[%s654_s6] sm:$0x1] }
  0xe2   :  { %v90_v23 = vrot.slane %v89_v21, 1  ;;  %v97_v24 = vadd.f32 %v96_v22, %v95_v20 }
  0xe4   :  { %v91_v25 = vadd.f32 %v90_v23, %v89_v21  ;;  %v98_v26 = vrot.slane %v97_v24, 1 }
  0xe6   :  { %v92_v27 = vmul.f32 0.125, %v91_v25  ;;  %v99_v28 = vadd.f32 %v98_v26, %v97_v24 }
  0xe8   :  { %v100_v29 = vmul.f32 0.125, %v99_v28  ;;  %v101_v30 = vmul.f32 %v92_v27, %v92_v27  ;;  %v399_v28 = vld [vmem:[%s655_s8] ss:$0 sm:$0xff] }
  0xea   :  { %v102_v31 = vsub.f32 %v100_v29, %v101_v30 }
  0xec   :  { %v103_v32 = vmax.f32 %v102_v31, 0.0 }
  0xee   :  { %v105_v33 = vadd.f32 1e-05, %v103_v32 }
  0xf0   :  { %493 = vrsqrt.f32 %v105_v33 }
  0xfa   :  { %v494_v38 = vpop.eup %493 }
  0xfb   :  { %v107_v39 = vmul.f32 %v494_v38, %v104_v36 }
  0xfd   :  { %v115_v41 = vrot.slane %v107_v39, %v595_v37  ;;  %v109_v42 = vmul.f32 %v107_v39, %v92_v27 }
  0xff   :  { %v110_v43 = vsub.f32 %v108_v40, %v109_v42  ;;  %v117_v44 = vmul.f32 %v115_v41, %v80_v11 }
 0x101   :  { %v122_v45 = vrot.slane %v110_v43, %v595_v37 }
 0x103   :  { %v124_v46 = vadd.f32 %v122_v45, %v117_v44 }
 0x105   :  { %v125_v47 = vmax.f32 %v124_v46, 0.0 }
 0x107   :  { %v126_v48 = vpack.c.bf16 %v125_v47, %v125_v47 }
 0x109   :  { %451 = vmatmul.mubr.bf16.vlgmr.msra.gmra.mrb[0].mxu1 %v126_v48 }
 0x1dc   :  { %v225_v57 = vpop.f32.mrb[0].mxu1 }
 0x1dd   :  { %v231_v58 = vrot.slane %v225_v57, 4  ;;  %v238_v59 = vmul.f32 %v225_v57, %v225_v57  ;;  %v452_v60 = vpop.f32.mrb[1].mxu1 }
 0x1de   :  { %v228_v61 = vpop.f32.mrb[2].mxu1 }
 0x1df   :  { %v232_v62 = vadd.f32 %v231_v58, %v225_v57  ;;  %v239_v63 = vrot.slane %v238_v59, 4  ;;  %v453_v1 = vpop.f32.mrb[3].mxu1 }
 0x1e1   :  { %v233_v2 = vrot.slane %v232_v62, 2  ;;  %v240_v3 = vadd.f32 %v239_v63, %v238_v59 }
 0x1e3   :  { %v234_v4 = vadd.f32 %v233_v2, %v232_v62  ;;  %v241_v5 = vrot.slane %v240_v3, 2 }
 0x1e5   :  { %v235_v6 = vrot.slane %v234_v4, 1  ;;  %v242_v7 = vadd.f32 %v241_v5, %v240_v3 }
 0x1e7   :  { %v236_v0 = vadd.f32 %v235_v6, %v234_v4  ;;  %v243_v8 = vrot.slane %v242_v7, 1 }
 0x1e9   :  { %v237_v9 = vmul.f32 0.125, %v236_v0  ;;  %v244_v10 = vadd.f32 %v243_v8, %v242_v7 }
 0x1eb   :  { %v245_v11 = vmul.f32 0.125, %v244_v10  ;;  %v246_v12 = vmul.f32 %v237_v9, %v237_v9 }
 0x1ed   :  { %v247_v13 = vsub.f32 %v245_v11, %v246_v12 }
 0x1ef   :  { %v248_v14 = vmax.f32 %v247_v13, 0.0 }
 0x1f1   :  { %v250_v15 = vadd.f32 1e-05, %v248_v14 }
 0x1f3   :  { %495 = vrsqrt.f32 %v250_v15 }
 0x1fd   :  { %v496_v17 = vpop.eup %495 }
 0x1fe   :  { %v252_v18 = vmul.f32 %v496_v17, %v249_v16 }
 0x200   :  { %v254_v20 = vmul.f32 %v252_v18, %v237_v9  ;;  %v260_v21 = vrot.slane %v252_v18, %v595_v37 }
 0x202   :  { %v255_v22 = vsub.f32 %v253_v19, %v254_v20  ;;  %v262_v23 = vmul.f32 %v260_v21, %v225_v57 }
 0x204   :  { %v267_v24 = vrot.slane %v255_v22, %v595_v37 }
 0x206   :  { %v269_v25 = vadd.f32 %v267_v24, %v262_v23 }
 0x208   :  { %v270_v26 = vmax.f32 %v269_v25, 0.0 }
 0x20a   :  { %v271_v27 = vpack.c.bf16 %v270_v26, %v270_v26 }
 0x20c   :  { %471 = vmatmul.mubr.bf16.vlgmr.msra.gmra.mrb[4].mxu0 %v271_v27 }
 0x2df   :  { %v377_v29 = vpop.f32.mrb[4].mxu0 }
 0x2e0   :  { %v378_v30 = vadd.f32 %v399_v28, %v377_v29  ;;  %v472_v31 = vpop.f32.mrb[5].mxu0 }
 0x2e1   :  { %v380_v32 = vpop.f32.mrb[6].mxu0 }
 0x2e2   :  { %384 = vst.msk [vmem:[%s656_s9] sm:$0xff] %vm383_vm2, %v378_v30  ;;  %v473_v33 = vpop.f32.mrb[7].mxu0 }

</bundles_post_ra>
